<compile_context>
chip_gen: v7x
topology: tpu7x:2x2x1
jax: 0.10.0
libtpu: 0.0.40
codegen_flags: <defaults>
</compile_context>

<pallas_src>
import jax
import jax.numpy as jnp
from jax.experimental import pallas as pl
from jax.experimental.pallas import tpu as pltpu


def _round_up(x, m):
    return ((x + m - 1) // m) * m


# -----------------------------------------------------------------------------
# One-shot param-prep kernel: per-class logits table T[c] = MLP(c), all classes.
# Single invocation, every block is the full (small) array.
# -----------------------------------------------------------------------------
def _class_table_kernel(emb_ref, w1_ref, b1_ref, w2_ref, b2_ref,
                        w3_ref, b3_ref, tbl_ref):
    # nn.Dropout(0.5): identity in eval/inference mode.
    # TODO(synk): training-mode stochastic dropout (pltpu.prng_*) not implemented;
    #             this table precompute is only valid in eval mode.
    h = jnp.dot(emb_ref[...], w1_ref[...], preferred_element_type=jnp.float32)
    h = jnp.maximum(h + b1_ref[...], 0.0)
    h = jnp.dot(h, w2_ref[...], preferred_element_type=jnp.float32)
    h = jnp.maximum(h + b2_ref[...], 0.0)
    t = jnp.dot(h, w3_ref[...], preferred_element_type=jnp.float32) + b3_ref[...]
    tbl_ref[...] = t.astype(tbl_ref.dtype)


def prepare_params(params):
    """One-time prep: pad the class axis to a lane-dense multiple of 128 and
    precompute the per-class logits table."""
    theta = params["theta"]                  # (1, n)
    emb = params["emb"]                      # (n, H)
    w1t, b1 = params["w1t"], params["b1"]    # (H, H), (H,)  (PyTorch (out,in) weights pre-transposed)
    w2t, b2 = params["w2t"], params["b2"]
    w3t, b3 = params["w3t"], params["b3"]    # (H, n), (n,)

    n = theta.shape[1]
    hidden = emb.shape[1]
    n_pad = _round_up(n, 128)

    theta_p = jnp.pad(theta, ((0, 0), (0, n_pad - n)))
    emb_p = jnp.pad(emb, ((0, n_pad - n), (0, 0)))
    w3t_p = jnp.pad(w3t, ((0, 0), (0, n_pad - n)))
    b3_p = jnp.pad(b3.reshape(1, n), ((0, 0), (0, n_pad - n)))

    table_p = pl.pallas_call(
        _class_table_kernel,
        out_shape=jax.ShapeDtypeStruct((n_pad, n_pad), jnp.float32),
    )(emb_p, w1t, b1.reshape(1, hidden), w2t, b2.reshape(1, hidden), w3t_p, b3_p)

    return {"theta_p": theta_p, "table_p": table_p, "n": n, "n_pad": n_pad,
            "dtype": theta.dtype}


# -----------------------------------------------------------------------------
# Per-call forward kernel: fused theta broadcast + one-hot row gather (MXU).
# -----------------------------------------------------------------------------
def _forward_kernel(idx_ref, theta_ref, table_ref, theta_out_ref, logits_out_ref):
    tb, n_pad = logits_out_ref.shape

    # ---- head 1: WarmUpModel.forward = theta.repeat((B, 1)) ----
    theta_out_ref[...] = jnp.broadcast_to(
        theta_ref[...], (tb, n_pad)).astype(theta_out_ref.dtype)

    # ---- head 2: logits = T[idx] as onehot @ T (exact row selection; one MXU op) ----
    idx = idx_ref[...]                                           # (tb, 1) int32
    classes = jax.lax.broadcasted_iota(jnp.int32, (tb, n_pad), 1)
    onehot = (classes == idx).astype(table_ref.dtype)            # (tb, n_pad)
    logits = jnp.dot(onehot, table_ref[...], preferred_element_type=jnp.float32)
    logits_out_ref[...] = logits.astype(logits_out_ref.dtype)


def two_dimension_forward_padded(prepped, x):
    """Fast path: returns padded (b_pad, n_pad) outputs straight from the kernel
    (no post-kernel slice copy)."""
    theta_p = prepped["theta_p"]
    table_p = prepped["table_p"]
    n_pad = prepped["n_pad"]
    dtype = prepped["dtype"]
    batch = x.shape[0]

    # Batch tile: multiple of 8, capped at 128 (one-hot + output tiles stay well
    # under the 64-vreg file -> no spills), and >= 2 grid steps once batch >= 16
    # so v7x's two TensorCores both get work on the "parallel" axis.
    tb = max(8, min(128, _round_up(pl.cdiv(batch, 2), 8)))
    b_pad = _round_up(batch, tb)

    idx = x[:, 0].astype(jnp.int32).reshape(batch, 1)
    if b_pad != batch:
        idx = jnp.pad(idx, ((0, b_pad - batch), (0, 0)))

    const = lambda i: (0, 0)   # parameters: same block every step -> VMEM-resident
    tiled = lambda i: (i, 0)   # batch-tiled operand / outputs

    theta_out, logits_out = pl.pallas_call(
        _forward_kernel,
        out_shape=(
            jax.ShapeDtypeStruct((b_pad, n_pad), dtype),
            jax.ShapeDtypeStruct((b_pad, n_pad), dtype),
        ),
        grid=(b_pad // tb,),
        in_specs=[
            pl.BlockSpec((tb, 1), tiled),          # class indices x[:, 0]
            pl.BlockSpec((1, n_pad), const),       # theta (padded)
            pl.BlockSpec((n_pad, n_pad), const),   # per-class logits table
        ],
        out_specs=(
            pl.BlockSpec((tb, n_pad), tiled),
            pl.BlockSpec((tb, n_pad), tiled),
        ),
        compiler_params=pltpu.CompilerParams(
            dimension_semantics=("parallel",)),
    )(idx, theta_p, table_p)
    return theta_out, logits_out


def two_dimension_forward(prepped, x):
    """TwoDimensionModel.forward: x (B, >=1) int -> (theta_rep (B, n), logits (B, n))."""
    n = prepped["n"]
    batch = x.shape[0]
    theta_out, logits_out = two_dimension_forward_padded(prepped, x)
    if theta_out.shape != (batch, n):      # slice only if padding was applied
        theta_out = theta_out[:batch, :n]
        logits_out = logits_out[:batch, :n]
    return theta_out, logits_out


if __name__ == "__main__":
    key = jax.random.PRNGKey(0)
    n, hidden, batch = 200, 32, 8
    keys = jax.random.split(key, 9)

    params = {
        "theta": jax.random.normal(keys[0], (1, n), jnp.float32),
        "emb":   jax.random.normal(keys[1], (n, hidden), jnp.float32),
        "w1t":   jax.random.normal(keys[2], (hidden, hidden), jnp.float32) * 0.1,
        "b1":    jax.random.normal(keys[3], (hidden,), jnp.float32) * 0.1,
        "w2t":   jax.random.normal(keys[4], (hidden, hidden), jnp.float32) * 0.1,
        "b2":    jax.random.normal(keys[5], (hidden,), jnp.float32) * 0.1,
        "w3t":   jax.random.normal(keys[6], (hidden, n), jnp.float32) * 0.1,
        "b3":    jax.random.normal(keys[7], (n,), jnp.float32) * 0.1,
    }
    x = jax.random.randint(keys[8], (batch, 2), 0, n, dtype=jnp.int32)

    prepped = prepare_params(params)                    # one-time param prep
    theta_rep, logits = jax.block_until_ready(two_dimension_forward(prepped, x))

    # Plain-JAX reference (eval-mode dropout = identity).
    x1 = x[:, 0]
    ref_theta = jnp.broadcast_to(params["theta"], (batch, n))
    h = params["emb"][x1]
    h = jnp.maximum(h @ params["w1t"] + params["b1"], 0.0)
    h = jnp.maximum(h @ params["w2t"] + params["b2"], 0.0)
    ref_logits = h @ params["w3t"] + params["b3"]

    assert theta_rep.shape == (batch, n) and logits.shape == (batch, n)
    assert jnp.allclose(theta_rep, ref_theta)
    assert jnp.allclose(logits, ref_logits, rtol=2e-2, atol=2e-2), float(
        jnp.max(jnp.abs(logits - ref_logits)))

    print("KERNEL_OK")
</pallas_src>

<mosaic_0001>
module attributes {stable_mosaic.version = 11 : i64} {
  func.func @_class_table_kernel(%arg0: memref<256x32xf32, #tpu.memory_space<vmem>>, %arg1: memref<32x32xf32, #tpu.memory_space<vmem>>, %arg2: memref<1x32xf32, #tpu.memory_space<vmem>>, %arg3: memref<32x32xf32, #tpu.memory_space<vmem>>, %arg4: memref<1x32xf32, #tpu.memory_space<vmem>>, %arg5: memref<32x256xf32, #tpu.memory_space<vmem>>, %arg6: memref<1x256xf32, #tpu.memory_space<vmem>>, %arg7: memref<256x256xf32, #tpu.memory_space<vmem>>) attributes {dimension_semantics = [], scalar_prefetch = 0 : i64, scratch_operands = 0 : i64, tpu.core_type = #tpu.core_type<tc>} {
    %c0 = arith.constant 0 : index
    %c0_0 = arith.constant 0 : index
    %0 = vector.load %arg0[%c0, %c0_0] : memref<256x32xf32, #tpu.memory_space<vmem>>, vector<256x32xf32>
    %c0_1 = arith.constant 0 : index
    %c0_2 = arith.constant 0 : index
    %1 = vector.load %arg1[%c0_1, %c0_2] : memref<32x32xf32, #tpu.memory_space<vmem>>, vector<32x32xf32>
    %cst = arith.constant dense<0.000000e+00> : vector<256x32xf32>
    %2 = tpu.matmul %0, %1, %cst {dimension_numbers = #tpu.dot_dimension_numbers<[1], [0], [0], [1], [0, 0, 1, 1], [], []>} : vector<256x32xf32>, vector<32x32xf32>, vector<256x32xf32> -> vector<256x32xf32>
    %c0_3 = arith.constant 0 : index
    %c0_4 = arith.constant 0 : index
    %3 = vector.load %arg2[%c0_3, %c0_4] : memref<1x32xf32, #tpu.memory_space<vmem>>, vector<1x32xf32>
    %4 = vector.broadcast %3 : vector<1x32xf32> to vector<256x32xf32>
    %5 = arith.addf %2, %4 : vector<256x32xf32>
    %cst_5 = arith.constant 0.000000e+00 : f32
    %6 = vector.broadcast %cst_5 : f32 to vector<256x32xf32>
    %7 = arith.maximumf %5, %6 : vector<256x32xf32>
    %c0_6 = arith.constant 0 : index
    %c0_7 = arith.constant 0 : index
    %8 = vector.load %arg3[%c0_6, %c0_7] : memref<32x32xf32, #tpu.memory_space<vmem>>, vector<32x32xf32>
    %cst_8 = arith.constant dense<0.000000e+00> : vector<256x32xf32>
    %9 = tpu.matmul %7, %8, %cst_8 {dimension_numbers = #tpu.dot_dimension_numbers<[1], [0], [0], [1], [0, 0, 1, 1], [], []>} : vector<256x32xf32>, vector<32x32xf32>, vector<256x32xf32> -> vector<256x32xf32>
    %c0_9 = arith.constant 0 : index
    %c0_10 = arith.constant 0 : index
    %10 = vector.load %arg4[%c0_9, %c0_10] : memref<1x32xf32, #tpu.memory_space<vmem>>, vector<1x32xf32>
    %11 = vector.broadcast %10 : vector<1x32xf32> to vector<256x32xf32>
    %12 = arith.addf %9, %11 : vector<256x32xf32>
    %cst_11 = arith.constant 0.000000e+00 : f32
    %13 = vector.broadcast %cst_11 : f32 to vector<256x32xf32>
    %14 = arith.maximumf %12, %13 : vector<256x32xf32>
    %c0_12 = arith.constant 0 : index
    %c0_13 = arith.constant 0 : index
    %15 = vector.load %arg5[%c0_12, %c0_13] : memref<32x256xf32, #tpu.memory_space<vmem>>, vector<32x256xf32>
    %cst_14 = arith.constant dense<0.000000e+00> : vector<256x256xf32>
    %16 = tpu.matmul %14, %15, %cst_14 {dimension_numbers = #tpu.dot_dimension_numbers<[1], [0], [0], [1], [0, 0, 1, 1], [], []>} : vector<256x32xf32>, vector<32x256xf32>, vector<256x256xf32> -> vector<256x256xf32>
    %c0_15 = arith.constant 0 : index
    %c0_16 = arith.constant 0 : index
    %17 = vector.load %arg6[%c0_15, %c0_16] : memref<1x256xf32, #tpu.memory_space<vmem>>, vector<1x256xf32>
    %18 = vector.broadcast %17 : vector<1x256xf32> to vector<256x256xf32>
    %19 = arith.addf %16, %18 : vector<256x256xf32>
    %c0_17 = arith.constant 0 : index
    %c0_18 = arith.constant 0 : index
    %20 = vector.load %arg7[%c0_17, %c0_18] : memref<256x256xf32, #tpu.memory_space<vmem>>, vector<256x256xf32>
    tpu.vector_store %arg7[%c0_17, %c0_18], %19 {strides = array<i32>} : memref<256x256xf32, #tpu.memory_space<vmem>>, vector<256x256xf32>,
    return
  }
}

</mosaic_0001>

<bundles_post_ra>
// kernel: tpu_custom_call.1
= control target key start
LH: loop header
LB: loop body
LE: loop exit
PB: predicated region body
PF: predicated region fallthrough
CT: control target
= control target key end

     0   :  { %vm70_vm0 = vcmask 261120   ;;  %s2063_s0 = inlined_call_operand.vmem [shape: f32[256,32], index: 0, kind: input, shape index: {}]   ;;  %s2064_s1 = inlined_call_operand.vmem [shape: f32[32,32], index: 1, kind: input, shape index: {}]   ;;  %s2065_s2 = inlined_call_operand.vmem [shape: f32[1,32], index: 2, kind: input, shape index: {}]   ;;  %s2066_s3 = inlined_call_operand.vmem [shape: f32[32,32], index: 3, kind: input, shape index: {}]   ;;  %s2067_s4 = inlined_call_operand.vmem [shape: f32[1,32], index: 4, kind: input, shape index: {}]   ;;  %s2068_s5 = inlined_call_operand.vmem [shape: f32[32,256], index: 5, kind: input, shape index: {}]   ;;  %s2069_s6 = inlined_call_operand.vmem [shape: f32[1,256], index: 6, kind: input, shape index: {}]   ;;  %s2070_s7 = inlined_call_operand.hbm [shape: f32[256,256], index: 7, kind: output, shape index: {}]  }
   0x1   :  { %v59_v0 = vld [vmem:[%s2064_s1] sm:$0xff]  ;;  %v60_v1 = vld [vmem:[%s2064_s1 + $0x8] sm:$0xff]  ;;  %v61_v2 = vld [vmem:[%s2064_s1 + $0x10] sm:$0xff] }
   0x2   :  { %v1523_v3 = vpack.c.bf16 %v60_v1, %v59_v0  ;;  %v62_v4 = vld [vmem:[%s2064_s1 + $0x18] sm:$0xff]  ;;  %v27_v5 = vld [vmem:[%s2063_s0] sm:$0xff]  ;;  %v28_v7 = vld [vmem:[%s2063_s0 + $0x8] sm:$0xff] }
   0x3   :  { %v1527_v6 = vpack.c.bf16 %v62_v4, %v61_v2  ;;  %1419 = vmatprep.mubr.msk.f32.mxu1 %vm70_vm0, %v27_v5  ;;  %v29_v8 = vld [vmem:[%s2063_s0 + $0x10] sm:$0xff]  ;;  %v30_v9 = vld [vmem:[%s2063_s0 + $0x18] sm:$0xff]  ;;  %v424_v10 = vld [vmem:[%s2066_s3] sm:$0xff] }
   0x4   :  { %1524 = vmatprep.subr.bf16.mxu1 %v1523_v3  ;;  %v425_v11 = vld [vmem:[%s2066_s3 + $0x8] sm:$0xff]  ;;  %v426_v12 = vld [vmem:[%s2066_s3 + $0x10] sm:$0xff]  ;;  %v31_v13 = vld [vmem:[%s2063_s0 + $0x20] sm:$0xff] }
   0x5   :  { %1526 = vmatpush3.bf16.msra.mxu1 %v1523_v3  ;;  %v1531_v14 = vpack.c.bf16 %v425_v11, %v424_v10  ;;  %v427_v15 = vld [vmem:[%s2066_s3 + $0x18] sm:$0xff] }
   0x6   :  { %1528 = vmatprep.subr.bf16.mxu1 %v1527_v6 }
   0x9   :  { %1530 = vmatpush3.bf16.msra.mxu1 %v1527_v6 }
   0xc   :  { %1420 = vmatmul.mubr.msk.f32.vlgmr.msra.gmra.mrb[0].mxu1 %vm70_vm0, %v28_v7 }
   0xd   :  { %1422 = vmatprep.mubr.msk.f32.mxu1 %vm70_vm0, %v29_v8 }
   0xe   :  { %12 = vsyncpa [#allocation3], 0  ;;  %v1535_v16 = vpack.c.bf16 %v427_v15, %v426_v12  ;;  %1532 = vmatprep.subr.bf16.mxu1 %v1531_v14  ;;  %v32_v17 = vld [vmem:[%s2063_s0 + $0x28] sm:$0xff]  ;;  %v33_v18 = vld [vmem:[%s2063_s0 + $0x30] sm:$0xff] }
   0xf   :  { %1534 = vmatpush3.bf16.msra.mxu1 %v1531_v14  ;;  %v34_v19 = vld [vmem:[%s2063_s0 + $0x38] sm:$0xff]  ;;  %v35_v20 = vld [vmem:[%s2063_s0 + $0x40] sm:$0xff]  ;;  %v36_v21 = vld [vmem:[%s2063_s0 + $0x48] sm:$0xff] }
  0x10   :  { %1423 = vmatmul.mubr.msk.f32.gmra.mrb[2].mxu1 %vm70_vm0, %v30_v9  ;;  %1536 = vmatprep.subr.bf16.mxu1 %v1535_v16  ;;  %v37_v22 = vld [vmem:[%s2063_s0 + $0x50] sm:$0xff]  ;;  %v38_v23 = vld [vmem:[%s2063_s0 + $0x58] sm:$0xff]  ;;  %v39_v24 = vld [vmem:[%s2063_s0 + $0x60] sm:$0xff] }
  0x11   :  { %1425 = vmatprep.mubr.msk.f32.mxu1 %vm70_vm0, %v31_v13  ;;  %v40_v25 = vld [vmem:[%s2063_s0 + $0x68] sm:$0xff]  ;;  %v41_v26 = vld [vmem:[%s2063_s0 + $0x70] sm:$0xff]  ;;  %v42_v27 = vld [vmem:[%s2063_s0 + $0x78] sm:$0xff] }
  0x12   :  { %v43_v28 = vld [vmem:[%s2063_s0 + $0x80] sm:$0xff]  ;;  %v44_v29 = vld [vmem:[%s2063_s0 + $0x88] sm:$0xff]  ;;  %v45_v30 = vld [vmem:[%s2063_s0 + $0x90] sm:$0xff] }
  0x13   :  { %1538 = vmatpush3.bf16.msra.mxu1 %v1535_v16  ;;  %v46_v31 = vld [vmem:[%s2063_s0 + $0x98] sm:$0xff]  ;;  %v47_v32 = vld [vmem:[%s2063_s0 + $0xa0] sm:$0xff]  ;;  %v48_v33 = vld [vmem:[%s2063_s0 + $0xa8] sm:$0xff] }
  0x14   :  { %1426 = vmatmul.mubr.msk.f32.gmra.mrb[4].mxu1 %vm70_vm0, %v32_v17  ;;  %v49_v34 = vld [vmem:[%s2063_s0 + $0xb0] sm:$0xff]  ;;  %v50_v35 = vld [vmem:[%s2063_s0 + $0xb8] sm:$0xff]  ;;  %v51_v36 = vld [vmem:[%s2063_s0 + $0xc0] sm:$0xff] }
  0x15   :  { %1428 = vmatprep.mubr.msk.f32.mxu1 %vm70_vm0, %v33_v18  ;;  %v52_v37 = vld [vmem:[%s2063_s0 + $0xc8] sm:$0xff]  ;;  %v53_v38 = vld [vmem:[%s2063_s0 + $0xd0] sm:$0xff]  ;;  %v54_v39 = vld [vmem:[%s2063_s0 + $0xd8] sm:$0xff] }
  0x16   :  { %v55_v40 = vld [vmem:[%s2063_s0 + $0xe0] sm:$0xff]  ;;  %v56_v41 = vld [vmem:[%s2063_s0 + $0xe8] sm:$0xff]  ;;  %v57_v42 = vld [vmem:[%s2063_s0 + $0xf0] sm:$0xff] }
  0x17   :  { %v58_v43 = vld [vmem:[%s2063_s0 + $0xf8] sm:$0xff]  ;;  %v789_v44 = vld [vmem:[%s2068_s5 + $0x8] sm:$0xff]  ;;  %v788_v46 = vld [vmem:[%s2068_s5] sm:$0xff] }
  0x18   :  { %1429 = vmatmul.mubr.msk.f32.gmra.mrb[6].mxu1 %vm70_vm0, %v34_v19  ;;  %v791_v45 = vld [vmem:[%s2068_s5 + $0x18] sm:$0xff]  ;;  %v790_v48 = vld [vmem:[%s2068_s5 + $0x10] sm:$0xff]  ;;  %v1786_v50 = vld [vmem:[%s2065_s2] ss:$0 sm:$0xff] }
  0x19   :  { %1431 = vmatprep.mubr.msk.f32.mxu1 %vm70_vm0, %v35_v20  ;;  %v1539_v47 = vpack.c.bf16 %v791_v45, %v789_v44  ;;  %v1541_v49 = vpack.c.bf16 %v790_v48, %v788_v46 }
  0x1b   :  { %1540 = vmatprep.subr.bf16.mxu0 %v1539_v47 }
  0x1c   :  { %1432 = vmatmul.mubr.msk.f32.gmra.mrb[8].mxu1 %vm70_vm0, %v36_v21  ;;  %1542 = vmatpush1.bf16.msra.mxu0 %v1541_v49 }
  0x1d   :  { %1434 = vmatprep.mubr.msk.f32.mxu1 %vm70_vm0, %v37_v22 }
  0x20   :  { %1435 = vmatmul.mubr.msk.f32.gmra.mrb[10].mxu1 %vm70_vm0, %v38_v23 }
  0x21   :  { %1437 = vmatprep.mubr.msk.f32.mxu1 %vm70_vm0, %v39_v24 }
  0x24   :  { %1438 = vmatmul.mubr.msk.f32.gmra.mrb[12].mxu1 %vm70_vm0, %v40_v25 }
  0x25   :  { %1440 = vmatprep.mubr.msk.f32.mxu1 %vm70_vm0, %v41_v26 }
  0x28   :  { %1441 = vmatmul.mubr.msk.f32.gmra.mrb[14].mxu1 %vm70_vm0, %v42_v27 }
  0x29   :  { %1443 = vmatprep.mubr.msk.f32.mxu1 %vm70_vm0, %v43_v28 }
  0x2c   :  { %1444 = vmatmul.mubr.msk.f32.gmra.mrb[16].mxu1 %vm70_vm0, %v44_v29 }
  0x2d   :  { %1446 = vmatprep.mubr.msk.f32.mxu1 %vm70_vm0, %v45_v30 }
  0x30   :  { %1447 = vmatmul.mubr.msk.f32.gmra.mrb[18].mxu1 %vm70_vm0, %v46_v31 }
  0x31   :  { %1449 = vmatprep.mubr.msk.f32.mxu1 %vm70_vm0, %v47_v32 }
  0x34   :  { %1450 = vmatmul.mubr.msk.f32.gmra.mrb[20].mxu1 %vm70_vm0, %v48_v33 }
  0x35   :  { %1452 = vmatprep.mubr.msk.f32.mxu1 %vm70_vm0, %v49_v34 }
  0x38   :  { %1453 = vmatmul.mubr.msk.f32.gmra.mrb[22].mxu1 %vm70_vm0, %v50_v35 }
  0x39   :  { %1455 = vmatprep.mubr.msk.f32.mxu1 %vm70_vm0, %v51_v36 }
  0x3c   :  { %1456 = vmatmul.mubr.msk.f32.gmra.mrb[24].mxu1 %vm70_vm0, %v52_v37 }
  0x3d   :  { %1458 = vmatprep.mubr.msk.f32.mxu1 %vm70_vm0, %v53_v38 }
  0x40   :  { %1459 = vmatmul.mubr.msk.f32.gmra.mrb[26].mxu1 %vm70_vm0, %v54_v39 }
  0x41   :  { %1461 = vmatprep.mubr.msk.f32.mxu1 %vm70_vm0, %v55_v40 }
  0x44   :  { %1462 = vmatmul.mubr.msk.f32.gmra.mrb[28].mxu1 %vm70_vm0, %v56_v41 }
  0x45   :  { %1464 = vmatprep.mubr.msk.f32.mxu1 %vm70_vm0, %v57_v42 }
  0x48   :  { %1465 = vmatmul.mubr.msk.f32.gmra.mrb[30].mxu1 %vm70_vm0, %v58_v43 }
  0xdf   :  { %v1421_v51 = vpop.f32.mrb[0].mxu1 }
  0xe0   :  { %v239_v52 = vadd.f32 %v1421_v51, %v1786_v50  ;;  %v233_v53 = vpop.f32.mrb[1].mxu1 }
  0xe1   :  { %v234_v54 = vadd.f32 %v1786_v50, %v233_v53 }
  0xe2   :  { %v393_v57 = vmax.f32 %v239_v52, 0.0 }
  0xe3   :  { %v392_v55 = vmax.f32 %v234_v54, 0.0  ;;  %v1424_v56 = vpop.f32.mrb[2].mxu1 }
  0xe4   :  { %v249_v58 = vadd.f32 %v1424_v56, %v1786_v50  ;;  %v243_v59 = vpop.f32.mrb[3].mxu1 }
  0xe5   :  { %v244_v60 = vadd.f32 %v1786_v50, %v243_v59  ;;  %1475 = vmatprep.mubr.msk.f32.mxu1 %vm70_vm0, %v392_v55 }
  0xe6   :  { %v395_v61 = vmax.f32 %v249_v58, 0.0  ;;  %1476 = vmatmul.mubr.msk.f32.vlgmr.msra.gmra.mrb[32].mxu1 %vm70_vm0, %v393_v57 }
  0xe7   :  { %v394_v62 = vmax.f32 %v244_v60, 0.0  ;;  %v1427_v63 = vpop.f32.mrb[4].mxu1 }
  0xe8   :  { %v259_v0 = vadd.f32 %v1427_v63, %v1786_v50  ;;  %v253_v1 = vpop.f32.mrb[5].mxu1 }
  0xe9   :  { %1478 = vmatprep.mubr.msk.f32.mxu1 %vm70_vm0, %v394_v62  ;;  %v254_v2 = vadd.f32 %v1786_v50, %v253_v1 }
  0xea   :  { %1479 = vmatmul.mubr.msk.f32.gmra.mrb[34].mxu1 %vm70_vm0, %v395_v61  ;;  %v397_v3 = vmax.f32 %v259_v0, 0.0 }
  0xeb   :  { %v396_v4 = vmax.f32 %v254_v2, 0.0  ;;  %v1430_v5 = vpop.f32.mrb[6].mxu1 }
  0xec   :  { %v269_v6 = vadd.f32 %v1430_v5, %v1786_v50  ;;  %v263_v7 = vpop.f32.mrb[7].mxu1 }
  0xed   :  { %1481 = vmatprep.mubr.msk.f32.mxu1 %vm70_vm0, %v396_v4  ;;  %v264_v8 = vadd.f32 %v1786_v50, %v263_v7 }
  0xee   :  { %1482 = vmatmul.mubr.msk.f32.gmra.mrb[36].mxu1 %vm70_vm0, %v397_v3  ;;  %v399_v9 = vmax.f32 %v269_v6, 0.0 }
  0xef   :  { %v398_v10 = vmax.f32 %v264_v8, 0.0  ;;  %v1433_v11 = vpop.f32.mrb[8].mxu1 }
  0xf0   :  { %v279_v12 = vadd.f32 %v1433_v11, %v1786_v50  ;;  %v273_v13 = vpop.f32.mrb[9].mxu1 }
  0xf1   :  { %1484 = vmatprep.mubr.msk.f32.mxu1 %vm70_vm0, %v398_v10  ;;  %v274_v14 = vadd.f32 %v1786_v50, %v273_v13 }
  0xf2   :  { %1485 = vmatmul.mubr.msk.f32.gmra.mrb[38].mxu1 %vm70_vm0, %v399_v9  ;;  %v401_v15 = vmax.f32 %v279_v12, 0.0 }
  0xf3   :  { %v400_v16 = vmax.f32 %v274_v14, 0.0  ;;  %v1436_v17 = vpop.f32.mrb[10].mxu1 }
  0xf4   :  { %v289_v18 = vadd.f32 %v1436_v17, %v1786_v50  ;;  %v283_v19 = vpop.f32.mrb[11].mxu1 }
  0xf5   :  { %1487 = vmatprep.mubr.msk.f32.mxu1 %vm70_vm0, %v400_v16  ;;  %v284_v20 = vadd.f32 %v1786_v50, %v283_v19 }
  0xf6   :  { %1488 = vmatmul.mubr.msk.f32.gmra.mrb[40].mxu1 %vm70_vm0, %v401_v15  ;;  %v403_v21 = vmax.f32 %v289_v18, 0.0 }
  0xf7   :  { %v402_v22 = vmax.f32 %v284_v20, 0.0  ;;  %v1439_v23 = vpop.f32.mrb[12].mxu1  ;;  %v793_v20 = vld [vmem:[%s2068_s5 + $0x28] sm:$0xff] }
  0xf8   :  { %v299_v24 = vadd.f32 %v1439_v23, %v1786_v50  ;;  %v293_v25 = vpop.f32.mrb[13].mxu1  ;;  %v794_v23 = vld [vmem:[%s2068_s5 + $0x30] sm:$0xff] }
  0xf9   :  { %1490 = vmatprep.mubr.msk.f32.mxu1 %vm70_vm0, %v402_v22  ;;  %v294_v26 = vadd.f32 %v1786_v50, %v293_v25  ;;  %v1575_v25 = vmov 0.0  }
  0xfa   :  { %1491 = vmatmul.mubr.msk.f32.gmra.mrb[42].mxu1 %vm70_vm0, %v403_v21  ;;  %v405_v27 = vmax.f32 %v299_v24, 0.0  ;;  %v795_v21 = vld [vmem:[%s2068_s5 + $0x38] sm:$0xff]  ;;  %968 = vmatprep.mubr.f32.mxu0 %v1575_v25 }
  0xfb   :  { %v404_v28 = vmax.f32 %v294_v26, 0.0  ;;  %v1442_v29 = vpop.f32.mrb[14].mxu1  ;;  %v1543_v22 = vpack.c.bf16 %v795_v21, %v793_v20  ;;  %v1868_v26 = vld [vmem:[%s2067_s4] ss:$0 sm:$0xff] }
  0xfc   :  { %v309_v30 = vadd.f32 %v1442_v29, %v1786_v50  ;;  %v303_v31 = vpop.f32.mrb[15].mxu1 }
  0xfd   :  { %1493 = vmatprep.mubr.msk.f32.mxu1 %vm70_vm0, %v404_v28  ;;  %v304_v32 = vadd.f32 %v1786_v50, %v303_v31  ;;  %1544 = vmatprep.subr.bf16.mxu0 %v1543_v22 }
  0xfe   :  { %1494 = vmatmul.mubr.msk.f32.gmra.mrb[44].mxu1 %vm70_vm0, %v405_v27  ;;  %v407_v33 = vmax.f32 %v309_v30, 0.0 }
  0xff   :  { %v406_v34 = vmax.f32 %v304_v32, 0.0  ;;  %v1445_v35 = vpop.f32.mrb[16].mxu1 }
 0x100   :  { %v319_v36 = vadd.f32 %v1445_v35, %v1786_v50  ;;  %v313_v37 = vpop.f32.mrb[17].mxu1 }
 0x101   :  { %1496 = vmatprep.mubr.msk.f32.mxu1 %vm70_vm0, %v406_v34  ;;  %v314_v38 = vadd.f32 %v1786_v50, %v313_v37 }
 0x102   :  { %1497 = vmatmul.mubr.msk.f32.gmra.mrb[46].mxu1 %vm70_vm0, %v407_v33  ;;  %v409_v39 = vmax.f32 %v319_v36, 0.0 }
 0x103   :  { %v408_v40 = vmax.f32 %v314_v38, 0.0  ;;  %v1448_v41 = vpop.f32.mrb[18].mxu1 }
 0x104   :  { %v329_v42 = vadd.f32 %v1448_v41, %v1786_v50  ;;  %v323_v43 = vpop.f32.mrb[19].mxu1 }
 0x105   :  { %1499 = vmatprep.mubr.msk.f32.mxu1 %vm70_vm0, %v408_v40  ;;  %v324_v44 = vadd.f32 %v1786_v50, %v323_v43 }
 0x106   :  { %1500 = vmatmul.mubr.msk.f32.gmra.mrb[48].mxu1 %vm70_vm0, %v409_v39  ;;  %v411_v45 = vmax.f32 %v329_v42, 0.0 }
 0x107   :  { %v410_v46 = vmax.f32 %v324_v44, 0.0  ;;  %v1451_v47 = vpop.f32.mrb[20].mxu1 }
 0x108   :  { %v339_v48 = vadd.f32 %v1451_v47, %v1786_v50  ;;  %v333_v49 = vpop.f32.mrb[21].mxu1 }
 0x109   :  { %1502 = vmatprep.mubr.msk.f32.mxu1 %vm70_vm0, %v410_v46  ;;  %v334_v51 = vadd.f32 %v1786_v50, %v333_v49 }
 0x10a   :  { %1503 = vmatmul.mubr.msk.f32.gmra.mrb[50].mxu1 %vm70_vm0, %v411_v45  ;;  %v413_v52 = vmax.f32 %v339_v48, 0.0 }
 0x10b   :  { %v412_v53 = vmax.f32 %v334_v51, 0.0  ;;  %v1454_v54 = vpop.f32.mrb[22].mxu1 }
 0x10c   :  { %v349_v55 = vadd.f32 %v1454_v54, %v1786_v50  ;;  %v343_v56 = vpop.f32.mrb[23].mxu1 }
 0x10d   :  { %1505 = vmatprep.mubr.msk.f32.mxu1 %vm70_vm0, %v412_v53  ;;  %v344_v57 = vadd.f32 %v1786_v50, %v343_v56 }
 0x10e   :  { %1506 = vmatmul.mubr.msk.f32.gmra.mrb[52].mxu1 %vm70_vm0, %v413_v52  ;;  %v415_v58 = vmax.f32 %v349_v55, 0.0 }
 0x10f   :  { %v414_v59 = vmax.f32 %v344_v57, 0.0  ;;  %v1457_v60 = vpop.f32.mrb[24].mxu1 }
 0x110   :  { %v359_v61 = vadd.f32 %v1457_v60, %v1786_v50  ;;  %v353_v62 = vpop.f32.mrb[25].mxu1 }
 0x111   :  { %1508 = vmatprep.mubr.msk.f32.mxu1 %vm70_vm0, %v414_v59  ;;  %v354_v63 = vadd.f32 %v1786_v50, %v353_v62 }
 0x112   :  { %1509 = vmatmul.mubr.msk.f32.gmra.mrb[54].mxu1 %vm70_vm0, %v415_v58  ;;  %v417_v0 = vmax.f32 %v359_v61, 0.0 }
 0x113   :  { %v416_v1 = vmax.f32 %v354_v63, 0.0  ;;  %v1460_v2 = vpop.f32.mrb[26].mxu1 }
 0x114   :  { %v369_v3 = vadd.f32 %v1460_v2, %v1786_v50  ;;  %v363_v4 = vpop.f32.mrb[27].mxu1 }
 0x115   :  { %1511 = vmatprep.mubr.msk.f32.mxu1 %vm70_vm0, %v416_v1  ;;  %v364_v5 = vadd.f32 %v1786_v50, %v363_v4 }
 0x116   :  { %1512 = vmatmul.mubr.msk.f32.gmra.mrb[56].mxu1 %vm70_vm0, %v417_v0  ;;  %v419_v6 = vmax.f32 %v369_v3, 0.0 }
 0x117   :  { %v418_v7 = vmax.f32 %v364_v5, 0.0  ;;  %v1463_v8 = vpop.f32.mrb[28].mxu1 }
 0x118   :  { %v379_v9 = vadd.f32 %v1463_v8, %v1786_v50  ;;  %v373_v10 = vpop.f32.mrb[29].mxu1 }
 0x119   :  { %1514 = vmatprep.mubr.msk.f32.mxu1 %vm70_vm0, %v418_v7  ;;  %v374_v11 = vadd.f32 %v1786_v50, %v373_v10 }
 0x11a   :  { %1515 = vmatmul.mubr.msk.f32.gmra.mrb[58].mxu1 %vm70_vm0, %v419_v6  ;;  %v421_v12 = vmax.f32 %v379_v9, 0.0 }
 0x11b   :  { %v420_v13 = vmax.f32 %v374_v11, 0.0  ;;  %v1466_v14 = vpop.f32.mrb[30].mxu1 }
 0x11c   :  { %v389_v15 = vadd.f32 %v1466_v14, %v1786_v50  ;;  %v383_v16 = vpop.f32.mrb[31].mxu1 }
 0x11d   :  { %1517 = vmatprep.mubr.msk.f32.mxu1 %vm70_vm0, %v420_v13  ;;  %v384_v17 = vadd.f32 %v1786_v50, %v383_v16  ;;  %v792_v50 = vld [vmem:[%s2068_s5 + $0x20] sm:$0xff] }
 0x11e   :  { %1518 = vmatmul.mubr.msk.f32.gmra.mrb[60].mxu1 %vm70_vm0, %v421_v12  ;;  %v423_v18 = vmax.f32 %v389_v15, 0.0  ;;  %v1545_v24 = vpack.c.bf16 %v794_v23, %v792_v50 }
 0x11f   :  { %v422_v19 = vmax.f32 %v384_v17, 0.0 }
 0x120   :  { %1546 = vmatpush1.bf16.msra.mxu0 %v1545_v24 }
 0x121   :  { %1520 = vmatprep.mubr.msk.f32.mxu1 %vm70_vm0, %v422_v19 }
 0x122   :  { %1521 = vmatmul.mubr.msk.f32.gmra.mrb[62].mxu1 %vm70_vm0, %v423_v18 }
 0x1b9   :  { %v1477_v27 = vpop.f32.mrb[32].mxu1 }
 0x1ba   :  { %v597_v28 = vpop.f32.mrb[33].mxu1  ;;  %v603_v30 = vadd.f32 %v1477_v27, %v1868_v26 }
 0x1bb   :  { %v598_v29 = vadd.f32 %v1868_v26, %v597_v28 }
 0x1bc   :  { %v757_v34 = vmax.f32 %v603_v30, 0.0 }
 0x1bd   :  { %v756_v31 = vmax.f32 %v598_v29, 0.0  ;;  %v1480_v32 = vpop.f32.mrb[34].mxu1 }
 0x1be   :  { %v607_v33 = vpop.f32.mrb[35].mxu1  ;;  %v613_v38 = vadd.f32 %v1480_v32, %v1868_v26 }
 0x1bf   :  { %1307 = vmatmul.mubr.msk.f32.vlgmr.msra.gmra.mrb[0].mxu0 %vm70_vm0, %v756_v31  ;;  %v608_v35 = vadd.f32 %v1868_v26, %v607_v33 }
 0x1c0   :  { %974 = vmatprep.mubr.f32.mxu0 %v1575_v25  ;;  %v759_v42 = vmax.f32 %v613_v38, 0.0 }
 0x1c1   :  { %v1483_v36 = vpop.f32.mrb[36].mxu1  ;;  %v758_v39 = vmax.f32 %v608_v35, 0.0 }
 0x1c2   :  { %v617_v37 = vpop.f32.mrb[37].mxu1  ;;  %v623_v46 = vadd.f32 %v1483_v36, %v1868_v26 }
 0x1c3   :  { %1308 = vmatmul.mubr.msk.f32.gmra.mrb[2].mxu0 %vm70_vm0, %v757_v34  ;;  %v618_v43 = vadd.f32 %v1868_v26, %v617_v37 }
 0x1c4   :  { %980 = vmatprep.mubr.f32.mxu0 %v1575_v25  ;;  %v761_v51 = vmax.f32 %v623_v46, 0.0 }
 0x1c5   :  { %v1486_v40 = vpop.f32.mrb[38].mxu1  ;;  %v760_v47 = vmax.f32 %v618_v43, 0.0 }
 0x1c6   :  { %v627_v41 = vpop.f32.mrb[39].mxu1  ;;  %v633_v55 = vadd.f32 %v1486_v40, %v1868_v26 }
 0x1c7   :  { %1309 = vmatmul.mubr.msk.f32.gmra.mrb[4].mxu0 %vm70_vm0, %v758_v39  ;;  %v628_v52 = vadd.f32 %v1868_v26, %v627_v41 }
 0x1c8   :  { %986 = vmatprep.mubr.f32.mxu0 %v1575_v25  ;;  %v763_v59 = vmax.f32 %v633_v55, 0.0 }
 0x1c9   :  { %v1489_v44 = vpop.f32.mrb[40].mxu1  ;;  %v762_v56 = vmax.f32 %v628_v52, 0.0 }
 0x1ca   :  { %v637_v45 = vpop.f32.mrb[41].mxu1  ;;  %v643_v1 = vadd.f32 %v1489_v44, %v1868_v26 }
 0x1cb   :  { %1310 = vmatmul.mubr.msk.f32.gmra.mrb[6].mxu0 %vm70_vm0, %v759_v42  ;;  %v638_v60 = vadd.f32 %v1868_v26, %v637_v45 }
 0x1cc   :  { %992 = vmatprep.mubr.f32.mxu0 %v1575_v25  ;;  %v765_v7 = vmax.f32 %v643_v1, 0.0 }
 0x1cd   :  { %v1492_v48 = vpop.f32.mrb[42].mxu1  ;;  %v764_v2 = vmax.f32 %v638_v60, 0.0 }
 0x1ce   :  { %v647_v49 = vpop.f32.mrb[43].mxu1  ;;  %v653_v13 = vadd.f32 %v1492_v48, %v1868_v26 }
 0x1cf   :  { %1311 = vmatmul.mubr.msk.f32.gmra.mrb[8].mxu0 %vm70_vm0, %v760_v47  ;;  %v648_v8 = vadd.f32 %v1868_v26, %v647_v49 }
 0x1d0   :  { %998 = vmatprep.mubr.f32.mxu0 %v1575_v25  ;;  %v767_v19 = vmax.f32 %v653_v13, 0.0 }
 0x1d1   :  { %v1495_v53 = vpop.f32.mrb[44].mxu1  ;;  %v766_v14 = vmax.f32 %v648_v8, 0.0 }
 0x1d2   :  { %v657_v54 = vpop.f32.mrb[45].mxu1  ;;  %v663_v24 = vadd.f32 %v1495_v53, %v1868_v26 }
 0x1d3   :  { %1312 = vmatmul.mubr.msk.f32.gmra.mrb[10].mxu0 %vm70_vm0, %v761_v51  ;;  %v658_v20 = vadd.f32 %v1868_v26, %v657_v54 }
 0x1d4   :  { %1004 = vmatprep.mubr.f32.mxu0 %v1575_v25  ;;  %v769_v32 = vmax.f32 %v663_v24, 0.0 }
 0x1d5   :  { %v1498_v57 = vpop.f32.mrb[46].mxu1  ;;  %v768_v27 = vmax.f32 %v658_v20, 0.0 }
 0x1d6   :  { %v667_v58 = vpop.f32.mrb[47].mxu1  ;;  %v673_v38 = vadd.f32 %v1498_v57, %v1868_v26 }
 0x1d7   :  { %1313 = vmatmul.mubr.msk.f32.gmra.mrb[12].mxu0 %vm70_vm0, %v762_v56  ;;  %v668_v33 = vadd.f32 %v1868_v26, %v667_v58 }
 0x1d8   :  { %1010 = vmatprep.mubr.f32.mxu0 %v1575_v25  ;;  %v771_v44 = vmax.f32 %v673_v38, 0.0 }
 0x1d9   :  { %v1501_v61 = vpop.f32.mrb[48].mxu1  ;;  %v770_v39 = vmax.f32 %v668_v33, 0.0 }
 0x1da   :  { %v1894_v62 = vadd.f32 %v1501_v61, %v1868_v26  ;;  %v677_v63 = vpop.f32.mrb[49].mxu1  ;;  %v798_v61 = vlaneseq }
 0x1db   :  { %1314 = vmatmul.mubr.msk.f32.gmra.mrb[14].mxu0 %vm70_vm0, %v763_v59  ;;  %v1898_v0 = vadd.f32 %v1868_v26, %v677_v63 }
 0x1dc   :  { %1016 = vmatprep.mubr.f32.mxu0 %v1575_v25  ;;  %v773_v46 = vmax.f32 %v1894_v62, 0.0  ;;  %v799_v62 = vshrl.u32 %v798_v61, 7 }
 0x1dd   :  { %v1504_v3 = vpop.f32.mrb[50].mxu1  ;;  %v772_v45 = vmax.f32 %v1898_v0, 0.0  ;;  %v796_v0 = vld [vmem:[%s2069_s6] sm:$0x3]  ;;  %s1576_s6 = smov [#allocation2]  }
 0x1de   :  { %v1903_v4 = vadd.f32 %v1504_v3, %v1868_v26  ;;  %v687_v5 = vpop.f32.mrb[51].mxu1  ;;  %v800_v63 = vsub.s32 0, %v799_v62  ;;  %v804_v1 = vsub.s32 1, %v799_v62  ;;  %s1230_s23 = sshll.u32 %s1576_s6, 4  ;;  %s1231_s23 = int_to_ptr.vmem [resolvable:$true] %s1230_s23 }
 0x1df   :  { %1315 = vmatmul.mubr.msk.f32.gmra.mrb[16].mxu0 %vm70_vm0, %v764_v2  ;;  %v688_v6 = vadd.f32 %v1868_v26, %v687_v5  ;;  %s1551_s24 = scalar_lea.vmem %s1231_s23, 8192  ;;  %p1556_p1 = scmp.lt.s32.totalorder %s1231_s23, %s1231_s23 }
 0x1e0   :  { %1022 = vmatprep.mubr.f32.mxu0 %v1575_v25  ;;  %v775_v47 = vmax.f32 %v1903_v4, 0.0  ;;  %v1983_v2 = vrot.slane %v796_v0, %v800_v63  ;;  %v1985_v3 = vrot.slane %v796_v0, %v804_v1  ;;  %p1552_p0 = scmp.ne.s32.totalorder %s1231_s23, %s1551_s24  ;;  %p1557_p2 = scmp.lt.s32.totalorder %s1551_s24, %s1551_s24 }
 0x1e1   :  { %v1507_v9 = vpop.f32.mrb[52].mxu1 }
 0x1e2   :  { %v1910_v10 = vadd.f32 %v1507_v9, %v1868_v26  ;;  %v697_v11 = vpop.f32.mrb[53].mxu1  ;;  %p1558_p3 = por %p1557_p2, %p1556_p1 }
 0x1e3   :  { %1316 = vmatmul.mubr.msk.f32.gmra.mrb[18].mxu0 %vm70_vm0, %v765_v7  ;;  %v698_v12 = vadd.f32 %v1868_v26, %v697_v11 }
 0x1e4   :  { %1028 = vmatprep.mubr.f32.mxu0 %v1575_v25  ;;  %v777_v49 = vmax.f32 %v1910_v10, 0.0  ;;  %p1559_p4 = pnand %p1558_p3, %p1552_p0 }
 0x1e5   :  { %v1510_v15 = vpop.f32.mrb[54].mxu1  ;;  %v776_v48 = vmax.f32 %v698_v12, 0.0 }
 0x1e6   :  { %v1917_v16 = vadd.f32 %v1510_v15, %v1868_v26  ;;  %v707_v17 = vpop.f32.mrb[55].mxu1 }
 0x1e7   :  { %1317 = vmatmul.mubr.msk.f32.gmra.mrb[20].mxu0 %vm70_vm0, %v766_v14  ;;  %v708_v18 = vadd.f32 %v1868_v26, %v707_v17 }
 0x1e8   :  { %1034 = vmatprep.mubr.f32.mxu0 %v1575_v25  ;;  %v779_v52 = vmax.f32 %v1917_v16, 0.0 }
 0x1e9   :  { %v1513_v21 = vpop.f32.mrb[56].mxu1  ;;  %v778_v51 = vmax.f32 %v708_v18, 0.0 }
 0x1ea   :  { %v723_v22 = vadd.f32 %v1513_v21, %v1868_v26  ;;  %v717_v50 = vpop.f32.mrb[57].mxu1 }
 0x1eb   :  { %1318 = vmatmul.mubr.msk.f32.gmra.mrb[22].mxu0 %vm70_vm0, %v767_v19  ;;  %v718_v23 = vadd.f32 %v1868_v26, %v717_v50 }
 0x1ec   :  { %1040 = vmatprep.mubr.f32.mxu0 %v1575_v25  ;;  %v781_v54 = vmax.f32 %v723_v22, 0.0 }
 0x1ed   :  { %v1516_v28 = vpop.f32.mrb[58].mxu1  ;;  %v780_v53 = vmax.f32 %v718_v23, 0.0 }
 0x1ee   :  { %v733_v29 = vadd.f32 %v1516_v28, %v1868_v26  ;;  %v727_v30 = vpop.f32.mrb[59].mxu1 }
 0x1ef   :  { %1319 = vmatmul.mubr.msk.f32.gmra.mrb[24].mxu0 %vm70_vm0, %v768_v27  ;;  %v728_v31 = vadd.f32 %v1868_v26, %v727_v30 }
 0x1f0   :  { %1046 = vmatprep.mubr.f32.mxu0 %v1575_v25  ;;  %v783_v56 = vmax.f32 %v733_v29, 0.0 }
 0x1f1   :  { %v1519_v34 = vpop.f32.mrb[60].mxu1  ;;  %v782_v55 = vmax.f32 %v728_v31, 0.0 }
 0x1f2   :  { %v743_v35 = vadd.f32 %v1519_v34, %v1868_v26  ;;  %v737_v36 = vpop.f32.mrb[61].mxu1 }
 0x1f3   :  { %1320 = vmatmul.mubr.msk.f32.gmra.mrb[26].mxu0 %vm70_vm0, %v769_v32  ;;  %v738_v37 = vadd.f32 %v1868_v26, %v737_v36 }
 0x1f4   :  { %1052 = vmatprep.mubr.f32.mxu0 %v1575_v25  ;;  %v785_v58 = vmax.f32 %v743_v35, 0.0 }
 0x1f5   :  { %v1522_v40 = vpop.f32.mrb[62].mxu1  ;;  %v784_v57 = vmax.f32 %v738_v37, 0.0 }
 0x1f6   :  { %v753_v41 = vadd.f32 %v1522_v40, %v1868_v26  ;;  %v747_v42 = vpop.f32.mrb[63].mxu1 }
 0x1f7   :  { %1321 = vmatmul.mubr.msk.f32.gmra.mrb[28].mxu0 %vm70_vm0, %v770_v39  ;;  %v748_v43 = vadd.f32 %v1868_v26, %v747_v42  ;;  %v774_v26 = vmax.f32 %v688_v6, 0.0 }
 0x1f8   :  { %1058 = vmatprep.mubr.f32.mxu0 %v1575_v25  ;;  %v787_v60 = vmax.f32 %v753_v41, 0.0 }
 0x1f9   :  { %v786_v59 = vmax.f32 %v748_v43, 0.0 }
 0x1fb   :  { %1322 = vmatmul.mubr.msk.f32.gmra.mrb[30].mxu0 %vm70_vm0, %v771_v44 }
 0x1fc   :  { %1064 = vmatprep.mubr.f32.mxu0 %v1575_v25 }
 0x1ff   :  { %1323 = vmatmul.mubr.msk.f32.gmra.mrb[32].mxu0 %vm70_vm0, %v772_v45 }
 0x200   :  { %1070 = vmatprep.mubr.f32.mxu0 %v1575_v25 }
 0x203   :  { %1324 = vmatmul.mubr.msk.f32.gmra.mrb[34].mxu0 %vm70_vm0, %v773_v46 }
 0x204   :  { %1076 = vmatprep.mubr.f32.mxu0 %v1575_v25 }
 0x207   :  { %1325 = vmatmul.mubr.msk.f32.gmra.mrb[36].mxu0 %vm70_vm0, %v774_v26 }
 0x208   :  { %1082 = vmatprep.mubr.f32.mxu0 %v1575_v25 }
 0x20b   :  { %1326 = vmatmul.mubr.msk.f32.gmra.mrb[38].mxu0 %vm70_vm0, %v775_v47 }
 0x20c   :  { %1088 = vmatprep.mubr.f32.mxu0 %v1575_v25 }
 0x20f   :  { %1327 = vmatmul.mubr.msk.f32.gmra.mrb[40].mxu0 %vm70_vm0, %v776_v48 }
 0x210   :  { %1094 = vmatprep.mubr.f32.mxu0 %v1575_v25 }
 0x213   :  { %1328 = vmatmul.mubr.msk.f32.gmra.mrb[42].mxu0 %vm70_vm0, %v777_v49 }
 0x214   :  { %1100 = vmatprep.mubr.f32.mxu0 %v1575_v25 }
 0x217   :  { %1329 = vmatmul.mubr.msk.f32.gmra.mrb[44].mxu0 %vm70_vm0, %v778_v51 }
 0x218   :  { %1106 = vmatprep.mubr.f32.mxu0 %v1575_v25 }
 0x21b   :  { %1330 = vmatmul.mubr.msk.f32.gmra.mrb[46].mxu0 %vm70_vm0, %v779_v52 }
 0x21c   :  { %1112 = vmatprep.mubr.f32.mxu0 %v1575_v25 }
 0x21f   :  { %1331 = vmatmul.mubr.msk.f32.gmra.mrb[48].mxu0 %vm70_vm0, %v780_v53 }
 0x220   :  { %1118 = vmatprep.mubr.f32.mxu0 %v1575_v25 }
 0x223   :  { %1332 = vmatmul.mubr.msk.f32.gmra.mrb[50].mxu0 %vm70_vm0, %v781_v54 }
 0x224   :  { %1124 = vmatprep.mubr.f32.mxu0 %v1575_v25 }
 0x227   :  { %1333 = vmatmul.mubr.msk.f32.gmra.mrb[52].mxu0 %vm70_vm0, %v782_v55 }
 0x228   :  { %1130 = vmatprep.mubr.f32.mxu0 %v1575_v25 }
 0x22b   :  { %1334 = vmatmul.mubr.msk.f32.gmra.mrb[54].mxu0 %vm70_vm0, %v783_v56 }
 0x22c   :  { %1136 = vmatprep.mubr.f32.mxu0 %v1575_v25 }
 0x22f   :  { %1335 = vmatmul.mubr.msk.f32.gmra.mrb[56].mxu0 %vm70_vm0, %v784_v57 }
 0x230   :  { %1142 = vmatprep.mubr.f32.mxu0 %v1575_v25 }
 0x233   :  { %1336 = vmatmul.mubr.msk.f32.gmra.mrb[58].mxu0 %vm70_vm0, %v785_v58 }
 0x234   :  { %1148 = vmatprep.mubr.f32.mxu0 %v1575_v25 }
 0x237   :  { %1337 = vmatmul.mubr.msk.f32.gmra.mrb[60].mxu0 %vm70_vm0, %v786_v59 }
 0x238   :  { %1154 = vmatprep.mubr.f32.mxu0 %v1575_v25 }
 0x23b   :  { %1338 = vmatmul.mubr.msk.f32.gmra.mrb[62].mxu0 %vm70_vm0, %v787_v60 }
 0x292   :  { %v970_v4 = vpop.f32.mrb[0].mxu0 }
 0x293   :  { %v971_v5 = vadd.f32 %v970_v4, %v1983_v2  ;;  %v972_v6 = vpop.f32.mrb[1].mxu0 }
 0x294   :  { %v973_v25 = vadd.f32 %v972_v6, %v1985_v3 }
 0x295   :  { %1161 = vst [vmem:[#allocation2] sm:$0xff] %v971_v5 }
 0x296   :  { %1162 = vst [vmem:[#allocation2 + $0x8] sm:$0xff] %v973_v25  ;;  %v976_v7 = vpop.f32.mrb[2].mxu0 }
 0x297   :  { %v977_v8 = vadd.f32 %v976_v7, %v1983_v2  ;;  %v978_v9 = vpop.f32.mrb[3].mxu0 }
 0x298   :  { %v979_v10 = vadd.f32 %v978_v9, %v1985_v3 }
 0x299   :  { %1163 = vst [vmem:[#allocation2 + $0x10] sm:$0xff] %v977_v8 }
 0x29a   :  { %1164 = vst [vmem:[#allocation2 + $0x18] sm:$0xff] %v979_v10  ;;  %v982_v11 = vpop.f32.mrb[4].mxu0 }
 0x29b   :  { %v983_v12 = vadd.f32 %v982_v11, %v1983_v2  ;;  %v984_v13 = vpop.f32.mrb[5].mxu0 }
 0x29c   :  { %v985_v14 = vadd.f32 %v984_v13, %v1985_v3 }
 0x29d   :  { %1165 = vst [vmem:[#allocation2 + $0x20] sm:$0xff] %v983_v12 }
 0x29e   :  { %1166 = vst [vmem:[#allocation2 + $0x28] sm:$0xff] %v985_v14  ;;  %v988_v15 = vpop.f32.mrb[6].mxu0 }
 0x29f   :  { %v989_v16 = vadd.f32 %v988_v15, %v1983_v2  ;;  %v990_v17 = vpop.f32.mrb[7].mxu0 }
 0x2a0   :  { %v991_v18 = vadd.f32 %v990_v17, %v1985_v3 }
 0x2a1   :  { %1167 = vst [vmem:[#allocation2 + $0x30] sm:$0xff] %v989_v16 }
 0x2a2   :  { %1168 = vst [vmem:[#allocation2 + $0x38] sm:$0xff] %v991_v18  ;;  %v994_v19 = vpop.f32.mrb[8].mxu0 }
 0x2a3   :  { %v995_v20 = vadd.f32 %v994_v19, %v1983_v2  ;;  %v996_v21 = vpop.f32.mrb[9].mxu0 }
 0x2a4   :  { %v997_v22 = vadd.f32 %v996_v21, %v1985_v3 }
 0x2a5   :  { %1169 = vst [vmem:[#allocation2 + $0x40] sm:$0xff] %v995_v20 }
 0x2a6   :  { %1170 = vst [vmem:[#allocation2 + $0x48] sm:$0xff] %v997_v22  ;;  %v1000_v50 = vpop.f32.mrb[10].mxu0 }
 0x2a7   :  { %v1001_v23 = vadd.f32 %v1000_v50, %v1983_v2  ;;  %v1002_v24 = vpop.f32.mrb[11].mxu0 }
 0x2a8   :  { %v1003_v27 = vadd.f32 %v1002_v24, %v1985_v3 }
 0x2a9   :  { %1171 = vst [vmem:[#allocation2 + $0x50] sm:$0xff] %v1001_v23 }
 0x2aa   :  { %1172 = vst [vmem:[#allocation2 + $0x58] sm:$0xff] %v1003_v27  ;;  %v1006_v28 = vpop.f32.mrb[12].mxu0 }
 0x2ab   :  { %v1007_v29 = vadd.f32 %v1006_v28, %v1983_v2  ;;  %v1008_v30 = vpop.f32.mrb[13].mxu0 }
 0x2ac   :  { %v1009_v31 = vadd.f32 %v1008_v30, %v1985_v3 }
 0x2ad   :  { %1173 = vst [vmem:[#allocation2 + $0x60] sm:$0xff] %v1007_v29 }
 0x2ae   :  { %1174 = vst [vmem:[#allocation2 + $0x68] sm:$0xff] %v1009_v31  ;;  %v1012_v32 = vpop.f32.mrb[14].mxu0 }
 0x2af   :  { %v1013_v33 = vadd.f32 %v1012_v32, %v1983_v2  ;;  %v1014_v34 = vpop.f32.mrb[15].mxu0 }
 0x2b0   :  { %v1015_v35 = vadd.f32 %v1014_v34, %v1985_v3 }
 0x2b1   :  { %1175 = vst [vmem:[#allocation2 + $0x70] sm:$0xff] %v1013_v33 }
 0x2b2   :  { %1176 = vst [vmem:[#allocation2 + $0x78] sm:$0xff] %v1015_v35  ;;  %v1018_v36 = vpop.f32.mrb[16].mxu0 }
 0x2b3   :  { %v1019_v37 = vadd.f32 %v1018_v36, %v1983_v2  ;;  %v1020_v38 = vpop.f32.mrb[17].mxu0 }
 0x2b4   :  { %v1021_v39 = vadd.f32 %v1020_v38, %v1985_v3 }
 0x2b5   :  { %1177 = vst [vmem:[#allocation2 + $0x80] sm:$0xff] %v1019_v37 }
 0x2b6   :  { %1178 = vst [vmem:[#allocation2 + $0x88] sm:$0xff] %v1021_v39  ;;  %v1024_v40 = vpop.f32.mrb[18].mxu0 }
 0x2b7   :  { %v1025_v41 = vadd.f32 %v1024_v40, %v1983_v2  ;;  %v1026_v42 = vpop.f32.mrb[19].mxu0 }
 0x2b8   :  { %v1027_v43 = vadd.f32 %v1026_v42, %v1985_v3 }
 0x2b9   :  { %1179 = vst [vmem:[#allocation2 + $0x90] sm:$0xff] %v1025_v41 }
 0x2ba   :  { %1180 = vst [vmem:[#allocation2 + $0x98] sm:$0xff] %v1027_v43  ;;  %v1030_v44 = vpop.f32.mrb[20].mxu0 }
 0x2bb   :  { %v1031_v45 = vadd.f32 %v1030_v44, %v1983_v2  ;;  %v1032_v46 = vpop.f32.mrb[21].mxu0 }
 0x2bc   :  { %v1033_v26 = vadd.f32 %v1032_v46, %v1985_v3 }
 0x2bd   :  { %1181 = vst [vmem:[#allocation2 + $0xa0] sm:$0xff] %v1031_v45 }
 0x2be   :  { %1182 = vst [vmem:[#allocation2 + $0xa8] sm:$0xff] %v1033_v26  ;;  %v1036_v47 = vpop.f32.mrb[22].mxu0 }
 0x2bf   :  { %v1037_v48 = vadd.f32 %v1036_v47, %v1983_v2  ;;  %v1038_v49 = vpop.f32.mrb[23].mxu0 }
 0x2c0   :  { %v1039_v51 = vadd.f32 %v1038_v49, %v1985_v3 }
 0x2c1   :  { %1183 = vst [vmem:[#allocation2 + $0xb0] sm:$0xff] %v1037_v48 }
 0x2c2   :  { %1184 = vst [vmem:[#allocation2 + $0xb8] sm:$0xff] %v1039_v51  ;;  %v1042_v52 = vpop.f32.mrb[24].mxu0 }
 0x2c3   :  { %v1043_v53 = vadd.f32 %v1042_v52, %v1983_v2  ;;  %v1044_v54 = vpop.f32.mrb[25].mxu0 }
 0x2c4   :  { %v1045_v55 = vadd.f32 %v1044_v54, %v1985_v3 }
 0x2c5   :  { %1185 = vst [vmem:[#allocation2 + $0xc0] sm:$0xff] %v1043_v53 }
 0x2c6   :  { %1186 = vst [vmem:[#allocation2 + $0xc8] sm:$0xff] %v1045_v55  ;;  %v1048_v56 = vpop.f32.mrb[26].mxu0 }
 0x2c7   :  { %v1049_v57 = vadd.f32 %v1048_v56, %v1983_v2  ;;  %v1050_v58 = vpop.f32.mrb[27].mxu0 }
 0x2c8   :  { %v1051_v59 = vadd.f32 %v1050_v58, %v1985_v3 }
 0x2c9   :  { %1187 = vst [vmem:[#allocation2 + $0xd0] sm:$0xff] %v1049_v57 }
 0x2ca   :  { %1188 = vst [vmem:[#allocation2 + $0xd8] sm:$0xff] %v1051_v59  ;;  %v1054_v60 = vpop.f32.mrb[28].mxu0 }
 0x2cb   :  { %v1055_v61 = vadd.f32 %v1054_v60, %v1983_v2  ;;  %v1056_v62 = vpop.f32.mrb[29].mxu0 }
 0x2cc   :  { %v1057_v63 = vadd.f32 %v1056_v62, %v1985_v3 }
 0x2cd   :  { %1189 = vst [vmem:[#allocation2 + $0xe0] sm:$0xff] %v1055_v61 }
 0x2ce   :  { %1190 = vst [vmem:[#allocation2 + $0xe8] sm:$0xff] %v1057_v63  ;;  %v1060_v0 = vpop.f32.mrb[30].mxu0 }
 0x2cf   :  { %v1061_v1 = vadd.f32 %v1060_v0, %v1983_v2  ;;  %v1062_v4 = vpop.f32.mrb[31].mxu0 }
 0x2d0   :  { %v1063_v5 = vadd.f32 %v1062_v4, %v1985_v3 }
 0x2d1   :  { %1191 = vst [vmem:[#allocation2 + $0xf0] sm:$0xff] %v1061_v1 }
 0x2d2   :  { %1192 = vst [vmem:[#allocation2 + $0xf8] sm:$0xff] %v1063_v5  ;;  %v1066_v6 = vpop.f32.mrb[32].mxu0 }
 0x2d3   :  { %v1067_v25 = vadd.f32 %v1066_v6, %v1983_v2  ;;  %v1068_v7 = vpop.f32.mrb[33].mxu0 }
 0x2d4   :  { %v1069_v8 = vadd.f32 %v1068_v7, %v1985_v3 }
 0x2d5   :  { %1193 = vst [vmem:[#allocation2 + $0x100] sm:$0xff] %v1067_v25 }
 0x2d6   :  { %1194 = vst [vmem:[#allocation2 + $0x108] sm:$0xff] %v1069_v8  ;;  %v1072_v9 = vpop.f32.mrb[34].mxu0 }
 0x2d7   :  { %v1073_v10 = vadd.f32 %v1072_v9, %v1983_v2  ;;  %v1074_v11 = vpop.f32.mrb[35].mxu0 }
 0x2d8   :  { %v1075_v12 = vadd.f32 %v1074_v11, %v1985_v3 }
 0x2d9   :  { %1195 = vst [vmem:[#allocation2 + $0x110] sm:$0xff] %v1073_v10 }
 0x2da   :  { %1196 = vst [vmem:[#allocation2 + $0x118] sm:$0xff] %v1075_v12  ;;  %v1078_v13 = vpop.f32.mrb[36].mxu0 }
 0x2db   :  { %v1079_v14 = vadd.f32 %v1078_v13, %v1983_v2  ;;  %v1080_v15 = vpop.f32.mrb[37].mxu0 }
 0x2dc   :  { %v1081_v16 = vadd.f32 %v1080_v15, %v1985_v3 }
 0x2dd   :  { %1197 = vst [vmem:[#allocation2 + $0x120] sm:$0xff] %v1079_v14 }
 0x2de   :  { %1198 = vst [vmem:[#allocation2 + $0x128] sm:$0xff] %v1081_v16  ;;  %v1084_v17 = vpop.f32.mrb[38].mxu0 }
 0x2df   :  { %v1085_v18 = vadd.f32 %v1084_v17, %v1983_v2  ;;  %v1086_v19 = vpop.f32.mrb[39].mxu0 }
 0x2e0   :  { %v1087_v20 = vadd.f32 %v1086_v19, %v1985_v3 }
 0x2e1   :  { %1199 = vst [vmem:[#allocation2 + $0x130] sm:$0xff] %v1085_v18 }
 0x2e2   :  { %1200 = vst [vmem:[#allocation2 + $0x138] sm:$0xff] %v1087_v20  ;;  %v1090_v21 = vpop.f32.mrb[40].mxu0 }
 0x2e3   :  { %v1091_v22 = vadd.f32 %v1090_v21, %v1983_v2  ;;  %v1092_v50 = vpop.f32.mrb[41].mxu0 }
 0x2e4   :  { %v1093_v23 = vadd.f32 %v1092_v50, %v1985_v3 }
 0x2e5   :  { %1201 = vst [vmem:[#allocation2 + $0x140] sm:$0xff] %v1091_v22 }
 0x2e6   :  { %1202 = vst [vmem:[#allocation2 + $0x148] sm:$0xff] %v1093_v23  ;;  %v1096_v24 = vpop.f32.mrb[42].mxu0 }
 0x2e7   :  { %v1097_v27 = vadd.f32 %v1096_v24, %v1983_v2  ;;  %v1098_v28 = vpop.f32.mrb[43].mxu0 }
 0x2e8   :  { %v1099_v29 = vadd.f32 %v1098_v28, %v1985_v3 }
 0x2e9   :  { %1203 = vst [vmem:[#allocation2 + $0x150] sm:$0xff] %v1097_v27 }
 0x2ea   :  { %1204 = vst [vmem:[#allocation2 + $0x158] sm:$0xff] %v1099_v29  ;;  %v1102_v30 = vpop.f32.mrb[44].mxu0 }
 0x2eb   :  { %v1103_v31 = vadd.f32 %v1102_v30, %v1983_v2  ;;  %v1104_v32 = vpop.f32.mrb[45].mxu0 }
 0x2ec   :  { %v1105_v33 = vadd.f32 %v1104_v32, %v1985_v3 }
 0x2ed   :  { %1205 = vst [vmem:[#allocation2 + $0x160] sm:$0xff] %v1103_v31 }
 0x2ee   :  { %1206 = vst [vmem:[#allocation2 + $0x168] sm:$0xff] %v1105_v33  ;;  %v1108_v34 = vpop.f32.mrb[46].mxu0 }
 0x2ef   :  { %v1109_v35 = vadd.f32 %v1108_v34, %v1983_v2  ;;  %v1110_v36 = vpop.f32.mrb[47].mxu0 }
 0x2f0   :  { %v1111_v37 = vadd.f32 %v1110_v36, %v1985_v3 }
 0x2f1   :  { %1207 = vst [vmem:[#allocation2 + $0x170] sm:$0xff] %v1109_v35 }
 0x2f2   :  { %1208 = vst [vmem:[#allocation2 + $0x178] sm:$0xff] %v1111_v37  ;;  %v1114_v38 = vpop.f32.mrb[48].mxu0 }
 0x2f3   :  { %v1115_v39 = vadd.f32 %v1114_v38, %v1983_v2  ;;  %v1116_v40 = vpop.f32.mrb[49].mxu0 }
 0x2f4   :  { %v1117_v41 = vadd.f32 %v1116_v40, %v1985_v3 }
 0x2f5   :  { %1209 = vst [vmem:[#allocation2 + $0x180] sm:$0xff] %v1115_v39 }
 0x2f6   :  { %1210 = vst [vmem:[#allocation2 + $0x188] sm:$0xff] %v1117_v41  ;;  %v1120_v42 = vpop.f32.mrb[50].mxu0 }
 0x2f7   :  { %v1121_v43 = vadd.f32 %v1120_v42, %v1983_v2  ;;  %v1122_v44 = vpop.f32.mrb[51].mxu0 }
 0x2f8   :  { %v1123_v45 = vadd.f32 %v1122_v44, %v1985_v3 }
 0x2f9   :  { %1211 = vst [vmem:[#allocation2 + $0x190] sm:$0xff] %v1121_v43 }
 0x2fa   :  { %1212 = vst [vmem:[#allocation2 + $0x198] sm:$0xff] %v1123_v45  ;;  %v1126_v46 = vpop.f32.mrb[52].mxu0 }
 0x2fb   :  { %v1127_v26 = vadd.f32 %v1126_v46, %v1983_v2  ;;  %v1128_v47 = vpop.f32.mrb[53].mxu0 }
 0x2fc   :  { %v1129_v48 = vadd.f32 %v1128_v47, %v1985_v3 }
 0x2fd   :  { %1213 = vst [vmem:[#allocation2 + $0x1a0] sm:$0xff] %v1127_v26 }
 0x2fe   :  { %1214 = vst [vmem:[#allocation2 + $0x1a8] sm:$0xff] %v1129_v48  ;;  %v1132_v49 = vpop.f32.mrb[54].mxu0 }
 0x2ff   :  { %v1133_v51 = vadd.f32 %v1132_v49, %v1983_v2  ;;  %v1134_v52 = vpop.f32.mrb[55].mxu0 }
 0x300   :  { %v1135_v53 = vadd.f32 %v1134_v52, %v1985_v3 }
 0x301   :  { %1215 = vst [vmem:[#allocation2 + $0x1b0] sm:$0xff] %v1133_v51 }
 0x302   :  { %1216 = vst [vmem:[#allocation2 + $0x1b8] sm:$0xff] %v1135_v53  ;;  %v1138_v54 = vpop.f32.mrb[56].mxu0 }
 0x303   :  { %v1139_v55 = vadd.f32 %v1138_v54, %v1983_v2  ;;  %v1140_v56 = vpop.f32.mrb[57].mxu0 }
 0x304   :  { %v1141_v57 = vadd.f32 %v1140_v56, %v1985_v3 }
 0x305   :  { %1217 = vst [vmem:[#allocation2 + $0x1c0] sm:$0xff] %v1139_v55 }
 0x306   :  { %1218 = vst [vmem:[#allocation2 + $0x1c8] sm:$0xff] %v1141_v57  ;;  %v1144_v58 = vpop.f32.mrb[58].mxu0 }
 0x307   :  { %v1145_v59 = vadd.f32 %v1144_v58, %v1983_v2  ;;  %v1146_v60 = vpop.f32.mrb[59].mxu0 }
 0x308   :  { %v1147_v61 = vadd.f32 %v1146_v60, %v1985_v3 }
 0x309   :  { %1219 = vst [vmem:[#allocation2 + $0x1d0] sm:$0xff] %v1145_v59 }
 0x30a   :  { %1220 = vst [vmem:[#allocation2 + $0x1d8] sm:$0xff] %v1147_v61  ;;  %v1150_v62 = vpop.f32.mrb[60].mxu0 }
 0x30b   :  { %v1151_v63 = vadd.f32 %v1150_v62, %v1983_v2  ;;  %v1152_v0 = vpop.f32.mrb[61].mxu0 }
 0x30c   :  { %v1153_v1 = vadd.f32 %v1152_v0, %v1985_v3 }
 0x30d   :  { %1221 = vst [vmem:[#allocation2 + $0x1e0] sm:$0xff] %v1151_v63 }
 0x30e   :  { %1222 = vst [vmem:[#allocation2 + $0x1e8] sm:$0xff] %v1153_v1  ;;  %v1156_v4 = vpop.f32.mrb[62].mxu0 }
 0x30f   :  { %v1157_v5 = vadd.f32 %v1156_v4, %v1983_v2  ;;  %v1158_v6 = vpop.f32.mrb[63].mxu0 }
 0x310   :  { %v1159_v25 = vadd.f32 %v1158_v6, %v1985_v3 }
 0x311   :  { %1223 = vst [vmem:[#allocation2 + $0x1f0] sm:$0xff] %v1157_v5 }
 0x312   :  { %1224 = vst [vmem:[#allocation2 + $0x1f8] sm:$0xff] %v1159_v25 }
 0x313   :  { %1562 = shalt.err (!%p1559_p4)
}
 0x314   :  { %s1563_s27 = scalar_lea.hbm %s2070_s7, 8192 }
 0x315   :  { %p1564_p5 = scmp.ne.s32.totalorder %s2070_s7, %s1563_s27  ;;  %p1567_p6 = scmp.lt.u32.totalorder %s1563_s27, %s2070_s7 }
 0x317   :  { %p1569_p7 = pnand %p1567_p6, %p1564_p5 }
 0x319   :  { %1572 = shalt.err (!%p1569_p7)
}
 0x31a   :  { %s1577_s8 = smov 256   ;;  %s1578_s9 = smov 16  }
 0x31b   :  { %1236 = dma.vmem_to_hbm [thread:$0]  %s1231_s23, 8192, %s2070_s7, [#allocation3], %s1577_s8, %s1577_s8, %s1578_s9  }
 0x31c   :  { %1573 = dma.done.wait [#allocation3], 8192  }
 0x31d   :  { %1574 = vsyncadd [#allocation3], 4294959104 }
 0x31e   :  { %1240 = vsyncpa [#allocation3], 1 }

</bundles_post_ra>
